<compile_context>
chip_gen: v7x
topology: tpu7x:2x2x1
jax: 0.10.0
libtpu: 0.0.40
codegen_flags: <defaults>
</compile_context>

<pallas_src>
import functools

import jax
import jax.numpy as jnp
from jax import lax
from jax.experimental import pallas as pl
from jax.experimental.pallas import tpu as pltpu

HIDDEN = 100            # logical hidden width of the PyTorch module
HIDDEN_PAD = 128        # padded to one full lane register
W3_ROWS = 8             # layer-3 weight stored transposed; row 0 real, rows 1..7 zero
MAX_BATCH_TILE = 2048   # rows per grid step (upper bound)
X_TILE_BUDGET = 16 * 1024 * 1024  # bytes for the double-buffered x tile


def _vmem_limit_bytes():
    """Generation-aware scoped-VMEM limit (~half of physical), with a safe fallback."""
    try:
        cap = int(pltpu.get_tpu_info().vmem_capacity_bytes)
    except Exception:  # pragma: no cover - conservative fallback (v7x per-core VMEM)
        cap = 64 * 1024 * 1024
    return max(16 * 1024 * 1024, min(cap // 2, 64 * 1024 * 1024))


def _pick_batch_tile(batch, row_bytes, x_budget_bytes):
    """Returns (batch_tile, grid).

    Single full-extent tile for small batches (always layout-legal). Otherwise the tile is
    a multiple of 128 (lane-dense (1, bt) output blocks, aligned x sublanes for f32/bf16),
    capped so the double-buffered x tile fits the budget, and capped at ~half the batch so
    there are >= 2 grid steps for v7x's two TensorCores.
    """
    if batch <= 128:
        return batch, 1
    cap = max(128, x_budget_bytes // (2 * max(row_bytes, 1)))
    bt = min(MAX_BATCH_TILE, cap)
    bt = max(128, (bt // 128) * 128)
    half = (((batch + 1) // 2) + 127) // 128 * 128
    bt = min(bt, half)
    grid = -(-batch // bt)
    return bt, grid


def _mlp_kernel(x_ref, w1_ref, b1_ref, w2_ref, b2_ref, w3t_ref, b3_ref, o_ref):
    # Layer 1: (bt, D)bf16 @ (D, 128)bf16 -> f32 acc, bias+ReLU in f32.
    # Padded lanes (>=100) stay exactly 0 through both hidden layers.
    x = x_ref[...].astype(jnp.bfloat16)  # no-op if mol_feature is already bf16
    h1 = jnp.dot(x, w1_ref[...], preferred_element_type=jnp.float32)
    h1 = jnp.maximum(h1 + b1_ref[...], 0.0)
    # Layer 2: (bt, 128)bf16 @ (128, 128)bf16 -> f32 acc, bias+ReLU in f32.
    h2 = jnp.dot(h1.astype(jnp.bfloat16), w2_ref[...],
                 preferred_element_type=jnp.float32)
    h2 = jnp.maximum(h2 + b2_ref[...], 0.0)
    # Layer 3 as a row-producing trans-B matmul (lane-dense output):
    #   (8, 128) . (bt, 128)^T -> (8, bt); only row 0 is real (rows 1..7 of w3t are 0).
    logits = lax.dot_general(
        w3t_ref[...], h2,
        dimension_numbers=(((1,), (1,)), ((), ())),
        preferred_element_type=jnp.float32,
    )
    o_ref[...] = jax.nn.sigmoid(logits[0:1, :] + b3_ref[0])


def init_params(key, fingerprint_dim):
    """Deterministic init mimicking nn.Linear default (uniform +-1/sqrt(fan_in)).
    Weights stored (in_features, out_features) so the forward is x @ W + b."""
    def linear(k, fan_in, fan_out):
        kw, kb = jax.random.split(k)
        bound = 1.0 / jnp.sqrt(float(fan_in))
        w = jax.random.uniform(kw, (fan_in, fan_out), jnp.float32, -bound, bound)
        b = jax.random.uniform(kb, (fan_out,), jnp.float32, -bound, bound)
        return w, b

    k1, k2, k3 = jax.random.split(key, 3)
    w1, b1 = linear(k1, fingerprint_dim, HIDDEN)
    w2, b2 = linear(k2, HIDDEN, HIDDEN)
    w3, b3 = linear(k3, HIDDEN, 1)
    return dict(w1=w1, b1=b1, w2=w2, b2=b2, w3=w3, b3=b3)


def pad_params(params):
    """One-time (outside the hot path) lane-padding / layout / dtype prep of parameters.
    Matmul weights are stored bf16 (f32 accumulation in-kernel); biases stay f32."""
    pad_h = HIDDEN_PAD - HIDDEN
    w1 = jnp.pad(params["w1"].astype(jnp.float32), ((0, 0), (0, pad_h)))           # (D, 128)
    b1 = jnp.pad(params["b1"].astype(jnp.float32)[None, :], ((0, 0), (0, pad_h)))  # (1, 128)
    w2 = jnp.pad(params["w2"].astype(jnp.float32), ((0, pad_h), (0, pad_h)))        # (128,128)
    b2 = jnp.pad(params["b2"].astype(jnp.float32)[None, :], ((0, 0), (0, pad_h)))  # (1, 128)
    # Layer-3 weight stored transposed as a lane-major row block; rows 1..7 are zero.
    w3t = jnp.pad(params["w3"].astype(jnp.float32).T,
                  ((0, W3_ROWS - 1), (0, pad_h)))                                    # (8, 128)
    b3 = params["b3"].astype(jnp.float32).reshape(1)                                 # SMEM scalar
    return dict(w1=w1.astype(jnp.bfloat16), b1=b1,
                w2=w2.astype(jnp.bfloat16), b2=b2,
                w3t=w3t, b3=b3)


@functools.partial(jax.jit, static_argnames=("reverse",))
def discriminator_hidden_forward(mol_feature, padded_params, reverse=False):
    """mol_feature: (B, fingerprint_dim), any float dtype -> (B, 1) f32 in (0, 1)."""
    del reverse  # GradientReverseModule is the identity in the forward pass.
    x = mol_feature  # native dtype: no extra HBM read+write pass for a wrapper astype
    B, D = x.shape

    row_bytes = D * jnp.dtype(x.dtype).itemsize
    bt, grid = _pick_batch_tile(B, row_bytes, X_TILE_BUDGET)
    out_cols = grid * bt
    p = padded_params

    vmem_res = lambda: pl.BlockSpec(memory_space=pltpu.MemorySpace.VMEM)  # resident, no dbl-buf

    out = pl.pallas_call(
        _mlp_kernel,
        out_shape=jax.ShapeDtypeStruct((1, out_cols), jnp.float32),
        grid_spec=pltpu.PrefetchScalarGridSpec(
            num_scalar_prefetch=0,
            grid=(grid,),
            in_specs=[
                pl.BlockSpec((bt, D), lambda i: (i, 0)),              # x tile (full D)
                vmem_res(),                                           # w1  (D, 128) bf16
                vmem_res(),                                           # b1  (1, 128) f32
                vmem_res(),                                           # w2  (128,128) bf16
                vmem_res(),                                           # b2  (1, 128) f32
                vmem_res(),                                           # w3^T (8,128) f32
                pl.BlockSpec(memory_space=pltpu.MemorySpace.SMEM),    # b3 scalar
            ],
            out_specs=pl.BlockSpec((1, bt), lambda i: (0, i)),        # lane-dense row
        ),
        compiler_params=pltpu.CompilerParams(
            dimension_semantics=("parallel",),
            vmem_limit_bytes=_vmem_limit_bytes(),
        ),
    )(x, p["w1"], p["b1"], p["w2"], p["b2"], p["w3t"], p["b3"])

    # (1, grid*bt) lane-dense row -> (B, 1); ragged-tile columns >= B are discarded.
    return out[0, :B, None]


def _reference_forward_f32(mol_feature, params):
    x = mol_feature.astype(jnp.float32)
    h1 = jnp.maximum(x @ params["w1"] + params["b1"], 0.0)
    h2 = jnp.maximum(h1 @ params["w2"] + params["b2"], 0.0)
    return jax.nn.sigmoid(h2 @ params["w3"] + params["b3"])


def _reference_forward_matched(mol_feature, padded):
    """Pure-JAX reference replicating the kernel's bf16-matmul / f32-accumulate path."""
    x = mol_feature.astype(jnp.bfloat16)
    h1 = jnp.maximum(
        jnp.dot(x, padded["w1"], preferred_element_type=jnp.float32) + padded["b1"], 0.0)
    h2 = jnp.maximum(
        jnp.dot(h1.astype(jnp.bfloat16), padded["w2"],
                preferred_element_type=jnp.float32) + padded["b2"], 0.0)
    logits = jnp.dot(h2, padded["w3t"][0:1, :].T, preferred_element_type=jnp.float32)
    return jax.nn.sigmoid(logits + padded["b3"])


if __name__ == "__main__":
    key = jax.random.PRNGKey(0)
    k_param, k_d1, k_d2, k_d3 = jax.random.split(key, 4)

    fingerprint_dim = 32
    batch = 4

    params = init_params(k_param, fingerprint_dim)
    padded = pad_params(params)

    # 1) Small-shape check (single full-extent tile).
    xs = jax.random.normal(k_d1, (batch, fingerprint_dim), jnp.float32)
    out = jax.block_until_ready(discriminator_hidden_forward(xs, padded))
    assert out.shape == (batch, 1), out.shape
    assert jnp.allclose(out, _reference_forward_matched(xs, padded), atol=2e-3), "small/matched"
    assert jnp.allclose(out, _reference_forward_f32(xs, params), atol=2e-2), "small/f32"

    # 2) Multi-tile path: grid >= 2, ragged last tile, lane-dense writeback.
    xb = jax.random.normal(k_d2, (1030, fingerprint_dim), jnp.float32)
    out_b = jax.block_until_ready(discriminator_hidden_forward(xb, padded))
    assert out_b.shape == (1030, 1), out_b.shape
    assert jnp.allclose(out_b, _reference_forward_matched(xb, padded), atol=2e-3), "big/matched"
    assert jnp.allclose(out_b, _reference_forward_f32(xb, params), atol=2e-2), "big/f32"

    # 3) Native-bf16 activation stream (no wrapper-side upcast), multi-tile.
    xh = jax.random.normal(k_d3, (300, fingerprint_dim), jnp.float32).astype(jnp.bfloat16)
    out_h = jax.block_until_ready(discriminator_hidden_forward(xh, padded))
    assert out_h.shape == (300, 1), out_h.shape
    assert jnp.allclose(out_h, _reference_forward_matched(xh, padded), atol=2e-3), "bf16/matched"

    print("KERNEL_OK")
</pallas_src>

<mosaic_0001>
module attributes {stable_mosaic.version = 11 : i64} {
  func.func @_mlp_kernel(%arg0: i32, %arg1: memref<4x32xf32, #tpu.memory_space<vmem>>, %arg2: memref<32x128xbf16, #tpu.memory_space<vmem>>, %arg3: memref<1x128xf32, #tpu.memory_space<vmem>>, %arg4: memref<128x128xbf16, #tpu.memory_space<vmem>>, %arg5: memref<1x128xf32, #tpu.memory_space<vmem>>, %arg6: memref<8x128xf32, #tpu.memory_space<vmem>>, %arg7: memref<1xf32, #tpu.memory_space<smem>>, %arg8: memref<1x4xf32, #tpu.memory_space<vmem>>) attributes {dimension_semantics = [#tpu.dimension_semantics<parallel>], iteration_bounds = array<i64: 1>, scalar_prefetch = 0 : i64, scratch_operands = 0 : i64, tpu.core_type = #tpu.core_type<tc>, window_params = [{transform_indices = @transform_0, window_bounds = array<i64: 4, 32>}, {pipeline_mode = #tpu.pipeline_mode<synchronous>, transform_indices = @transform_1, window_bounds = array<i64: 32, 128>}, {pipeline_mode = #tpu.pipeline_mode<synchronous>, transform_indices = @transform_2, window_bounds = array<i64: 1, 128>}, {pipeline_mode = #tpu.pipeline_mode<synchronous>, transform_indices = @transform_3, window_bounds = array<i64: 128, 128>}, {pipeline_mode = #tpu.pipeline_mode<synchronous>, transform_indices = @transform_4, window_bounds = array<i64: 1, 128>}, {pipeline_mode = #tpu.pipeline_mode<synchronous>, transform_indices = @transform_5, window_bounds = array<i64: 8, 128>}, {transform_indices = @transform_6, window_bounds = array<i64: 1>}, {transform_indices = @transform_7, window_bounds = array<i64: 1, 4>}]} {
    %c0 = arith.constant 0 : index
    %c0_0 = arith.constant 0 : index
    %0 = vector.load %arg1[%c0, %c0_0] : memref<4x32xf32, #tpu.memory_space<vmem>>, vector<4x32xf32>
    %1 = arith.truncf %0 : vector<4x32xf32> to vector<4x32xbf16>
    %c0_1 = arith.constant 0 : index
    %c0_2 = arith.constant 0 : index
    %2 = vector.load %arg2[%c0_1, %c0_2] : memref<32x128xbf16, #tpu.memory_space<vmem>>, vector<32x128xbf16>
    %cst = arith.constant dense<0.000000e+00> : vector<4x128xf32>
    %3 = tpu.matmul %1, %2, %cst {dimension_numbers = #tpu.dot_dimension_numbers<[1], [0], [0], [1], [0, 0, 1, 1], [], []>} : vector<4x32xbf16>, vector<32x128xbf16>, vector<4x128xf32> -> vector<4x128xf32>
    %c0_3 = arith.constant 0 : index
    %c0_4 = arith.constant 0 : index
    %4 = vector.load %arg3[%c0_3, %c0_4] : memref<1x128xf32, #tpu.memory_space<vmem>>, vector<1x128xf32>
    %5 = vector.broadcast %4 : vector<1x128xf32> to vector<4x128xf32>
    %6 = arith.addf %3, %5 : vector<4x128xf32>
    %cst_5 = arith.constant 0.000000e+00 : f32
    %7 = vector.broadcast %cst_5 : f32 to vector<4x128xf32>
    %8 = arith.maximumf %6, %7 : vector<4x128xf32>
    %9 = arith.truncf %8 : vector<4x128xf32> to vector<4x128xbf16>
    %c0_6 = arith.constant 0 : index
    %c0_7 = arith.constant 0 : index
    %10 = vector.load %arg4[%c0_6, %c0_7] : memref<128x128xbf16, #tpu.memory_space<vmem>>, vector<128x128xbf16>
    %cst_8 = arith.constant dense<0.000000e+00> : vector<4x128xf32>
    %11 = tpu.matmul %9, %10, %cst_8 {dimension_numbers = #tpu.dot_dimension_numbers<[1], [0], [0], [1], [0, 0, 1, 1], [], []>} : vector<4x128xbf16>, vector<128x128xbf16>, vector<4x128xf32> -> vector<4x128xf32>
    %c0_9 = arith.constant 0 : index
    %c0_10 = arith.constant 0 : index
    %12 = vector.load %arg5[%c0_9, %c0_10] : memref<1x128xf32, #tpu.memory_space<vmem>>, vector<1x128xf32>
    %13 = vector.broadcast %12 : vector<1x128xf32> to vector<4x128xf32>
    %14 = arith.addf %11, %13 : vector<4x128xf32>
    %cst_11 = arith.constant 0.000000e+00 : f32
    %15 = vector.broadcast %cst_11 : f32 to vector<4x128xf32>
    %16 = arith.maximumf %14, %15 : vector<4x128xf32>
    %c0_12 = arith.constant 0 : index
    %c0_13 = arith.constant 0 : index
    %17 = vector.load %arg6[%c0_12, %c0_13] : memref<8x128xf32, #tpu.memory_space<vmem>>, vector<8x128xf32>
    %cst_14 = arith.constant dense<0.000000e+00> : vector<8x4xf32>
    %18 = tpu.matmul %17, %16, %cst_14 {dimension_numbers = #tpu.dot_dimension_numbers<[1], [1], [0], [0], [0, 0, 1, 0], [], []>} : vector<8x128xf32>, vector<4x128xf32>, vector<8x4xf32> -> vector<8x4xf32>
    %19 = vector.extract_strided_slice %18 {offsets = [0, 0], sizes = [1, 4], strides = [1, 1]} : vector<8x4xf32> to vector<1x4xf32>
    %c0_15 = arith.constant 0 : index
    %20 = memref.load %arg7[%c0_15] : memref<1xf32, #tpu.memory_space<smem>>
    %21 = vector.broadcast %20 : f32 to vector<1x4xf32>
    %22 = arith.addf %19, %21 : vector<1x4xf32>
    %23 = arith.negf %22 : vector<1x4xf32>
    %24 = math.exp %23 : vector<1x4xf32>
    %cst_16 = arith.constant 1.000000e+00 : f32
    %25 = vector.broadcast %cst_16 : f32 to vector<1x4xf32>
    %26 = arith.addf %25, %24 : vector<1x4xf32>
    %27 = arith.divf %25, %26 : vector<1x4xf32>
    %c0_17 = arith.constant 0 : index
    %c0_18 = arith.constant 0 : index
    %28 = vector.load %arg8[%c0_17, %c0_18] : memref<1x4xf32, #tpu.memory_space<vmem>>, vector<1x4xf32>
    tpu.vector_store %arg8[%c0_17, %c0_18], %27 {strides = array<i32>} : memref<1x4xf32, #tpu.memory_space<vmem>>, vector<1x4xf32>,
    return
  }
  func.func @transform_0(%arg0: i32) -> (i32, i32) {
    %c0_i32 = arith.constant 0 : i32
    %c0_i32_0 = arith.constant 0 : i32
    return %arg0, %c0_i32 : i32, i32
  }
  func.func @transform_1(%arg0: i32) -> (i32, i32) {
    %c0_i32 = arith.constant 0 : i32
    %c0_i32_0 = arith.constant 0 : i32
    %c0_i32_1 = arith.constant 0 : i32
    return %c0_i32, %c0_i32_0 : i32, i32
  }
  func.func @transform_2(%arg0: i32) -> (i32, i32) {
    %c0_i32 = arith.constant 0 : i32
    %c0_i32_0 = arith.constant 0 : i32
    %c0_i32_1 = arith.constant 0 : i32
    return %c0_i32, %c0_i32_0 : i32, i32
  }
  func.func @transform_3(%arg0: i32) -> (i32, i32) {
    %c0_i32 = arith.constant 0 : i32
    %c0_i32_0 = arith.constant 0 : i32
    %c0_i32_1 = arith.constant 0 : i32
    return %c0_i32, %c0_i32_0 : i32, i32
  }
  func.func @transform_4(%arg0: i32) -> (i32, i32) {
    %c0_i32 = arith.constant 0 : i32
    %c0_i32_0 = arith.constant 0 : i32
    %c0_i32_1 = arith.constant 0 : i32
    return %c0_i32, %c0_i32_0 : i32, i32
  }
  func.func @transform_5(%arg0: i32) -> (i32, i32) {
    %c0_i32 = arith.constant 0 : i32
    %c0_i32_0 = arith.constant 0 : i32
    %c0_i32_1 = arith.constant 0 : i32
    return %c0_i32, %c0_i32_0 : i32, i32
  }
  func.func @transform_6(%arg0: i32) -> i32 {
    %c0_i32 = arith.constant 0 : i32
    %c0_i32_0 = arith.constant 0 : i32
    return %c0_i32 : i32
  }
  func.func @transform_7(%arg0: i32) -> (i32, i32) {
    %c0_i32 = arith.constant 0 : i32
    %c0_i32_0 = arith.constant 0 : i32
    return %c0_i32, %arg0 : i32, i32
  }
}

</mosaic_0001>

<bundles_post_ra>
// kernel: discriminator_hidden_forward.1
= control target key start
LH: loop header
LB: loop body
LE: loop exit
PB: predicated region body
PF: predicated region fallthrough
CT: control target
= control target key end

     0   :  { %13 = vsyncpa [#allocation4], 0  ;;  %s643_s0 = inlined_call_operand.hbm [shape: f32[4,32], index: 0, kind: input, shape index: {}]   ;;  %s644_s1 = inlined_call_operand.hbm [shape: bf16[32,128], index: 1, kind: input, shape index: {}]   ;;  %s645_s2 = inlined_call_operand.vmem [shape: f32[1,128], index: 2, kind: input, shape index: {}]   ;;  %s646_s3 = inlined_call_operand.hbm [shape: bf16[128,128], index: 3, kind: input, shape index: {}]   ;;  %s647_s4 = inlined_call_operand.vmem [shape: f32[1,128], index: 4, kind: input, shape index: {}]   ;;  %s648_s5 = inlined_call_operand.vmem [shape: f32[8,128], index: 5, kind: input, shape index: {}]   ;;  %s649_s6 = inlined_call_operand.<no memory space> [shape: f32[1], index: 6, kind: input, shape index: {}]   ;;  %s650_s7 = inlined_call_operand.hbm [shape: f32[1,4], index: 7, kind: output, shape index: {}]  }
   0x1   :  { %14 = vsyncpa [#allocation7], 0 }
   0x2   :  { %15 = vsyncpa [#allocation5], 0  ;;  %s526_s24 = smov [#allocation6]   ;;  %s432_s28 = scalar_lea.hbm %s644_s1, 256 }
   0x3   :  { %s31_s25 = sshll.u32 %s526_s24, 4  ;;  %p433_p0 = scmp.ne.s32.totalorder %s644_s1, %s432_s28  ;;  %s32_s25 = int_to_ptr.vmem [resolvable:$true] %s31_s25 }
   0x4   :  { %p436_p1 = scmp.lt.u32.totalorder %s432_s28, %s644_s1 }
   0x6   :  { %p438_p2 = pnand %p436_p1, %p433_p0 }
   0x8   :  { %441 = shalt.err (!%p438_p2)
}
   0x9   :  { %s442_s10 = scalar_lea.vmem %s32_s25, 256  ;;  %p447_p4 = scmp.lt.s32.totalorder %s32_s25, %s32_s25 }
   0xa   :  { %p443_p3 = scmp.ne.s32.totalorder %s32_s25, %s442_s10  ;;  %p448_p5 = scmp.lt.s32.totalorder %s442_s10, %s442_s10 }
   0xc   :  { %p449_p6 = por %p448_p5, %p447_p4 }
   0xe   :  { %p450_p7 = pnand %p449_p6, %p443_p3 }
  0x10   :  { %453 = shalt.err (!%p450_p7)
}
  0x11   :  { %s527_s11 = smov 64   ;;  %s528_s12 = smov 4  }
  0x12   :  { %37 = dma.hbm_to_vmem [thread:$0]  %s644_s1, 256, %s32_s25, [#allocation7], %s527_s11, %s527_s11, %s528_s12  }
  0x13   :  { %s529_s15 = smov [#allocation3]   ;;  %s530_s17 = smov [#allocation8]  }
  0x14   :  { %s22_s16 = sshll.u32 %s529_s15, 4  ;;  %s45_s18 = sshll.u32 %s530_s17, 4  ;;  %s23_s16 = int_to_ptr.vmem [resolvable:$true] %s22_s16  ;;  %s46_s18 = int_to_ptr.vmem [resolvable:$true] %s45_s18 }
  0x15   :  { %s454_s21 = scalar_lea.hbm %s643_s0, 64 }
  0x16   :  { %p455_p8 = scmp.ne.s32.totalorder %s643_s0, %s454_s21  ;;  %p458_p9 = scmp.lt.u32.totalorder %s454_s21, %s643_s0 }
  0x18   :  { %p460_p10 = pnand %p458_p9, %p455_p8 }
  0x1a   :  { %463 = shalt.err (!%p460_p10)
}
  0x1b   :  { %s464_s1 = scalar_lea.vmem %s23_s16, 64  ;;  %p469_p12 = scmp.lt.s32.totalorder %s23_s16, %s23_s16 }
  0x1c   :  { %p465_p11 = scmp.ne.s32.totalorder %s23_s16, %s464_s1  ;;  %p470_p13 = scmp.lt.s32.totalorder %s464_s1, %s464_s1 }
  0x1e   :  { %p471_p0 = por %p470_p13, %p469_p12 }
  0x20   :  { %p472_p1 = pnand %p471_p0, %p465_p11 }
  0x22   :  { %475 = shalt.err (!%p472_p1)
}
  0x23   :  { %25 = dma.hbm_to_vmem [thread:$0]  %s643_s0, 64, %s23_s16, [#allocation4]  }
  0x24   :  { %s476_s30 = scalar_lea.hbm %s646_s3, 1024 }
  0x25   :  { %p477_p2 = scmp.ne.s32.totalorder %s646_s3, %s476_s30  ;;  %p480_p3 = scmp.lt.u32.totalorder %s476_s30, %s646_s3 }
  0x27   :  { %p482_p4 = pnand %p480_p3, %p477_p2 }
  0x29   :  { %485 = shalt.err (!%p482_p4)
}
  0x2a   :  { %s486_s14 = scalar_lea.vmem %s46_s18, 1024  ;;  %p491_p6 = scmp.lt.s32.totalorder %s46_s18, %s46_s18 }
  0x2b   :  { %p487_p5 = scmp.ne.s32.totalorder %s46_s18, %s486_s14  ;;  %p492_p7 = scmp.lt.s32.totalorder %s486_s14, %s486_s14 }
  0x2d   :  { %p493_p8 = por %p492_p7, %p491_p6 }
  0x2f   :  { %p494_p9 = pnand %p493_p8, %p487_p5 }
  0x31   :  { %497 = shalt.err (!%p494_p9)
}
  0x32   :  { %51 = dma.hbm_to_vmem [thread:$0]  %s646_s3, 1024, %s46_s18, [#allocation7], %s527_s11, %s527_s11, %s528_s12  }
  0x33   :  { %520 = dma.done.wait [#allocation4], 64  }
  0x34   :  { %521 = vsyncadd [#allocation4], 4294967232 }
  0x35   :  { %522 = dma.done.wait [#allocation7], 1280  }
  0x36   :  { %523 = vsyncadd [#allocation7], 4294966016  ;;  %v531_v0 = vmov 0.0   ;;  %vm532_vm0 = vmmov 0   ;;  %v418_v1 = vld [vmem:[#allocation6] sm:$0xff]   ;;  %v419_v2 = vld [vmem:[#allocation6 + $0x8] sm:$0xff]   ;;  %v323_v29 = vstv %s649_s6 }
  0x37   :  { %377 = vmatprep.subr.bf16.mxu0 %v531_v0  ;;  %381 = vmatprep.mubr.msk.bf16.mxu0 %vm532_vm0, %v531_v0  ;;  %v68_v3 = vld [vmem:[#allocation3] sm:$0xf]  ;;  %v420_v4 = vld [vmem:[#allocation8] sm:$0xff]   ;;  %vm93_vm1 = vcmask 261120   ;;  %v422_v7 = vld [vmem:[#allocation8 + $0x10] sm:$0xff]   ;;  %vm331_vm2 = vcmask 24576  }
  0x38   :  { %385 = vmatprep.subr.bf16.mxu1 %v531_v0  ;;  %401 = vmatprep.mubr.msk.bf16.mxu1 %vm532_vm0, %v531_v0  ;;  %v69_v5 = vpack.c.bf16 %v68_v3, %v68_v3  ;;  %v421_v6 = vld [vmem:[#allocation8 + $0x8] sm:$0xff]   ;;  %v423_v8 = vld [vmem:[#allocation8 + $0x18] sm:$0xff]   ;;  %v424_v9 = vld [vmem:[#allocation8 + $0x20] sm:$0xff]  }
  0x39   :  { %378 = vmatpush3.bf16.msra.mxu0 %v418_v1  ;;  %386 = vmatpush3.bf16.msra.mxu1 %v420_v4  ;;  %v425_v10 = vld [vmem:[#allocation8 + $0x28] sm:$0xff]   ;;  %v426_v11 = vld [vmem:[#allocation8 + $0x30] sm:$0xff]   ;;  %v427_v12 = vld [vmem:[#allocation8 + $0x38] sm:$0xff]  }
  0x3a   :  { %379 = vmatprep.subr.bf16.mxu0 %v531_v0  ;;  %387 = vmatprep.subr.bf16.mxu1 %v531_v0  ;;  %v349_v13 = vld [vmem:[%s645_s2] ss:$0 sm:$0xff] }
  0x3b   :  { %v353_v21 = vld [vmem:[%s647_s4] ss:$0 sm:$0xff]  ;;  %s533_s4 = smov [#allocation9]  }
  0x3c   :  { %v251_v28 = vld [vmem:[%s648_s5] sm:$0xff]  ;;  %s339_s20 = sshll.u32 %s533_s4, 4  ;;  %s340_s20 = int_to_ptr.vmem [resolvable:$true] %s339_s20 }
  0x3d   :  { %380 = vmatpush3.bf16.msra.mxu0 %v419_v2  ;;  %388 = vmatpush3.bf16.msra.mxu1 %v421_v6  ;;  %s498_s5 = scalar_lea.vmem %s340_s20, 16  ;;  %s502_s21 = scalar_lea.vmem %s340_s20, 32 }
  0x3e   :  { %405 = vmatprep.subr.mxu0 %v531_v0  ;;  %389 = vmatprep.subr.bf16.mxu1 %v531_v0  ;;  %p499_p10 = scmp.ne.s32.totalorder %s340_s20, %s498_s5  ;;  %p503_p11 = scmp.lt.s32.totalorder %s340_s20, %s340_s20 }
  0x3f   :  { %p504_p12 = scmp.lt.s32.totalorder %s502_s21, %s498_s5 }
  0x40   :  { %382 = vmatmul.mubr.msk.bf16.vlgmr.msra.gmra.mrb[0].mxu0 %vm93_vm1, %v69_v5 }
  0x41   :  { %407 = vmatprep.mubr.msk.f32.mxu0 %vm532_vm0, %v531_v0  ;;  %390 = vmatpush3.bf16.msra.mxu1 %v422_v7  ;;  %p505_p13 = por %p504_p12, %p503_p11 }
  0x42   :  { %391 = vmatprep.subr.bf16.mxu1 %v531_v0 }
  0x43   :  { %p506_p0 = pnand %p505_p13, %p499_p10 }
  0x45   :  { %392 = vmatpush3.bf16.msra.mxu1 %v423_v8 }
  0x46   :  { %393 = vmatprep.subr.bf16.mxu1 %v531_v0 }
  0x49   :  { %394 = vmatpush3.bf16.msra.mxu1 %v424_v9 }
  0x4a   :  { %395 = vmatprep.subr.bf16.mxu1 %v531_v0 }
  0x4d   :  { %396 = vmatpush3.bf16.msra.mxu1 %v425_v10 }
  0x4e   :  { %397 = vmatprep.subr.bf16.mxu1 %v531_v0 }
  0x51   :  { %398 = vmatpush3.bf16.msra.mxu1 %v426_v11 }
  0x52   :  { %399 = vmatprep.subr.bf16.mxu1 %v531_v0 }
  0x55   :  { %400 = vmatpush3.bf16.msra.mxu1 %v427_v12 }
 0x113   :  { %v131_v14 = vpop.f32.mrb[0].mxu0 }
 0x114   :  { %v132_v15 = vadd.f32 %v349_v13, %v131_v14  ;;  %v383_v16 = vpop.f32.mrb[1].mxu0 }
 0x115   :  { %v134_v17 = vpop.f32.mrb[2].mxu0 }
 0x116   :  { %v137_v18 = vmax.f32 %v132_v15, 0.0  ;;  %v384_v19 = vpop.f32.mrb[3].mxu0 }
 0x118   :  { %v138_v20 = vpack.c.bf16 %v137_v18, %v137_v18 }
 0x11a   :  { %402 = vmatmul.mubr.bf16.vlgmr.msra.gmra.mrb[0].mxu1 %v138_v20 }
 0x1ed   :  { %v244_v22 = vpop.f32.mrb[0].mxu1 }
 0x1ee   :  { %v245_v23 = vadd.f32 %v353_v21, %v244_v22  ;;  %v403_v24 = vpop.f32.mrb[1].mxu1 }
 0x1ef   :  { %v247_v25 = vpop.f32.mrb[2].mxu1 }
 0x1f0   :  { %v250_v26 = vmax.f32 %v245_v23, 0.0  ;;  %v404_v27 = vpop.f32.mrb[3].mxu1 }
 0x1f2   :  { %406 = vmatpush3.xpose.msra.mxu0 %v250_v26 }
 0x1f5   :  { %408 = vmatmul.mubr.f32.vlgmr.msra.gmra.mrb[4].mxu0 %v251_v28 }
 0x2c8   :  { %v318_v30 = vpop.f32.mrb[4].mxu0 }
 0x2c9   :  { %v324_v31 = vadd.f32 %v323_v29, %v318_v30  ;;  %v409_v32 = vpop.f32.mrb[5].mxu0 }
 0x2cb   :  { %v362_v33 = vmul.f32 -1.442695, %v324_v31 }
 0x2cd   :  { %428 = vpow2.f32 %v362_v33 }
 0x2d7   :  { %v429_v34 = vpop.eup %428 }
 0x2d8   :  { %v328_v35 = vadd.f32 1.0, %v429_v34 }
 0x2da   :  { %430 = vrcp.f32 %v328_v35 }
 0x2e4   :  { %v431_v36 = vpop.eup %430 }
 0x2e5   :  { %332 = vst.msk [vmem:[#allocation9] sm:$0x1] %vm331_vm2, %v431_v36 }
 0x2e6   :  { %509 = shalt.err (!%p506_p0)
}
 0x2e7   :  { %s510_s23 = scalar_lea.hbm %s650_s7, 16 }
 0x2e8   :  { %p511_p1 = scmp.ne.s32.totalorder %s650_s7, %s510_s23  ;;  %p514_p2 = scmp.lt.u32.totalorder %s510_s23, %s650_s7 }
 0x2ea   :  { %p516_p3 = pnand %p514_p2, %p511_p1 }
 0x2ec   :  { %519 = shalt.err (!%p516_p3)
}
 0x2ed   :  { %342 = dma.vmem_to_hbm [thread:$0]  %s340_s20, 16, %s650_s7, [#allocation5]  }
 0x2ee   :  { %524 = dma.done.wait [#allocation5], 16  }
 0x2ef   :  { %525 = vsyncadd [#allocation5], 4294967280 }
 0x2f0   :  { %346 = vsyncpa [#allocation4], 1 }
 0x2f1   :  { %347 = vsyncpa [#allocation7], 1 }
 0x2f2   :  { %348 = vsyncpa [#allocation5], 1 }

</bundles_post_ra>
